<compile_context>
chip_gen: v6e
topology: v6e:2x2x1
jax: 0.10.0
libtpu: 0.0.40
codegen_flags: <defaults>
</compile_context>

<pallas_src>
import jax
import jax.numpy as jnp
from jax.experimental import pallas as pl
from jax.experimental.pallas import tpu as pltpu


def _round_up(x, m):
    return ((x + m - 1) // m) * m


# ----------------------------------------------------------------------------
# Kernel 1: parameters + KL (tiny, single block).
# ----------------------------------------------------------------------------
def params_kl_kernel(scal_ref, mu_ref, rho_ref, eps_ref, betas_ref, kl_ref):
    inv_tau2 = scal_ref[0]          # 1 / tau^2
    const = scal_ref[1]             # 2*p*log(tau) - p

    rho = rho_ref[...]              # (1, P)
    mu = mu_ref[...]                # (1, P)
    eps = eps_ref[...]              # (1, P)

    # Numerically stable softplus: max(x,0) + log1p(exp(-|x|)).
    beta_sig = jnp.maximum(rho, 0.0) + jnp.log1p(jnp.exp(-jnp.abs(rho)))
    betas_ref[...] = beta_sig * eps + mu

    # Stable log(softplus(rho)): for very negative rho, softplus(rho) ~= exp(rho).
    log_sig = jnp.where(rho < -15.0, rho, jnp.log(beta_sig))

    sum_sig2 = jnp.sum(beta_sig * beta_sig, axis=1, keepdims=True)   # (1,1)
    sum_logsig = jnp.sum(log_sig, axis=1, keepdims=True)             # (1,1)
    sum_mu2 = jnp.sum(mu * mu, axis=1, keepdims=True)                # (1,1)
    kl_ref[...] = 0.5 * ((sum_sig2 + sum_mu2) * inv_tau2
                         - 2.0 * sum_logsig + const)


# ----------------------------------------------------------------------------
# Kernel 2: logits = sum(x * betas, axis=1), streamed over row tiles of x.
# ----------------------------------------------------------------------------
def logits_kernel(betas_ref, x_ref, logits_ref):
    x = x_ref[...].astype(jnp.float32)       # (TN, P) -- cast in-kernel (VPU slack)
    betas = betas_ref[...]                   # (1, P), resident across grid steps
    logits_ref[...] = jnp.sum(x * betas, axis=1, keepdims=True)   # (TN, 1)


# ----------------------------------------------------------------------------
# Wrapper
# ----------------------------------------------------------------------------
def logisticreg_forward(x, beta_mu, beta_rho, eps, tau, *, tile_rows=None):
    """x: (N, P); beta_mu/beta_rho/eps: (P,); tau: float.
    Returns (logits (N,) f32, kl scalar f32)."""
    N, P = x.shape
    if not jnp.issubdtype(x.dtype, jnp.floating):
        x = x.astype(jnp.float32)            # keep bf16/f32 as-is (no upcast)

    mu2d = beta_mu.reshape(1, P).astype(jnp.float32)
    rho2d = beta_rho.reshape(1, P).astype(jnp.float32)
    eps2d = eps.reshape(1, P).astype(jnp.float32)

    tau_f = jnp.asarray(tau, dtype=jnp.float32)
    p_f = jnp.float32(P)
    scal = jnp.stack([1.0 / (tau_f * tau_f),
                      2.0 * p_f * jnp.log(tau_f) - p_f]).astype(jnp.float32)

    # ---- Kernel 1: betas + KL (runs once, O(P) work) ----
    betas2d, kl2d = pl.pallas_call(
        params_kl_kernel,
        out_shape=(jax.ShapeDtypeStruct((1, P), jnp.float32),
                   jax.ShapeDtypeStruct((1, 1), jnp.float32)),
        grid=(1,),
        in_specs=[
            pl.BlockSpec(memory_space=pltpu.SMEM),      # [1/tau^2, 2p*log(tau)-p]
            pl.BlockSpec((1, P), lambda i: (0, 0)),     # beta_mu
            pl.BlockSpec((1, P), lambda i: (0, 0)),     # beta_rho
            pl.BlockSpec((1, P), lambda i: (0, 0)),     # eps
        ],
        out_specs=(
            pl.BlockSpec((1, P), lambda i: (0, 0)),     # betas
            pl.BlockSpec((1, 1), lambda i: (0, 0)),     # kl
        ),
    )(scal, mu2d, rho2d, eps2d)

    # ---- Choose row tile: multiple of 8, per-buffer cap 16 MiB (safe for
    #      double-buffering within 64 MiB VMEM on v7x, 128 MiB on v5e/v6e) ----
    itemsize = jnp.dtype(x.dtype).itemsize
    per_buffer_bytes = 16 * 1024 * 1024
    rows_budget = max(8, (per_buffer_bytes // max(P * itemsize, 1)) // 8 * 8)
    n8 = _round_up(N, 8)
    TN = tile_rows if tile_rows is not None else min(n8, rows_budget)
    TN = max(8, _round_up(TN, 8))
    TN = min(TN, n8)

    N_pad = _round_up(N, TN)
    x_in = x if N_pad == N else jnp.pad(x, ((0, N_pad - N), (0, 0)))
    num_tiles = N_pad // TN

    # ---- Kernel 2: stream x over N with double-buffered tiles ----
    logits2d = pl.pallas_call(
        logits_kernel,
        out_shape=jax.ShapeDtypeStruct((N_pad, 1), jnp.float32),
        grid=(num_tiles,),
        in_specs=[
            pl.BlockSpec((1, P), lambda i: (0, 0)),     # betas (resident)
            pl.BlockSpec((TN, P), lambda i: (i, 0)),    # x tile
        ],
        out_specs=pl.BlockSpec((TN, 1), lambda i: (i, 0)),
        compiler_params=pltpu.CompilerParams(
            dimension_semantics=("parallel",),          # rows independent -> megacore
            vmem_limit_bytes=48 * 1024 * 1024,          # fits all generations
        ),
    )(betas2d, x_in)

    return logits2d[:N, 0], kl2d[0, 0]


# ----------------------------------------------------------------------------
# Reference (pure JAX) for verification
# ----------------------------------------------------------------------------
def reference_forward(x, beta_mu, beta_rho, eps, tau, p):
    beta_sig = jnp.log1p(jnp.exp(beta_rho))
    betas = beta_sig * eps + beta_mu
    kl = 0.5 * (jnp.sum(beta_sig ** 2) / tau ** 2
                - 2.0 * jnp.sum(jnp.log(beta_sig))
                + 2.0 * p * jnp.log(tau)
                + jnp.sum(beta_mu ** 2) / tau ** 2
                - p)
    logits = jnp.sum(x.astype(jnp.float32) * betas, axis=1)
    return logits, kl


if __name__ == "__main__":
    # Small synthetic problem: n = 60 data points, p = 128 features.
    # tile_rows=16 -> 4 grid steps (exercises tiling, pipelining and N-padding).
    N, P = 60, 128
    tau = 1.0

    key = jax.random.PRNGKey(0)
    kx, kmu, keps = jax.random.split(key, 3)

    x = jax.random.normal(kx, (N, P), dtype=jnp.float32)

    # Mirrors the module's __init__:
    #   beta_mu  <- beta_init.squeeze()    : (P,)
    #   beta_rho <- uniform(-1, -1) == -1  : (P,)
    beta_mu = jax.random.uniform(kmu, (P,), minval=0.5, maxval=2.0,
                                 dtype=jnp.float32)
    beta_rho = jnp.full((P,), -1.0, dtype=jnp.float32)

    # TODO(synk): the PyTorch forward draws fresh N(0,1) noise internally;
    # here it is drawn once and passed in for determinism.
    eps = jax.random.normal(keps, (P,), dtype=jnp.float32)

    logits, kl = logisticreg_forward(x, beta_mu, beta_rho, eps, tau,
                                     tile_rows=16)
    jax.block_until_ready((logits, kl))

    ref_logits, ref_kl = reference_forward(x, beta_mu, beta_rho, eps,
                                           jnp.float32(tau), float(P))

    assert logits.shape == (N,)
    assert jnp.allclose(logits, ref_logits, atol=1e-5, rtol=1e-5)
    assert jnp.allclose(kl, ref_kl, atol=1e-5, rtol=1e-5)

    print("KERNEL_OK")
</pallas_src>

<mosaic_0001>
module attributes {stable_mosaic.version = 11 : i64} {
  func.func @params_kl_kernel(%arg0: i32, %arg1: memref<2xf32, #tpu.memory_space<smem>>, %arg2: memref<1x128xf32, #tpu.memory_space<vmem>>, %arg3: memref<1x128xf32, #tpu.memory_space<vmem>>, %arg4: memref<1x128xf32, #tpu.memory_space<vmem>>, %arg5: memref<1x128xf32, #tpu.memory_space<vmem>>, %arg6: memref<1x1xf32, #tpu.memory_space<vmem>>) attributes {dimension_semantics = [#tpu.dimension_semantics<arbitrary>], iteration_bounds = array<i64: 1>, scalar_prefetch = 0 : i64, scratch_operands = 0 : i64, tpu.core_type = #tpu.core_type<tc>, window_params = [{transform_indices = @transform_0, window_bounds = array<i64: 2>}, {pipeline_mode = #tpu.pipeline_mode<synchronous>, transform_indices = @transform_1, window_bounds = array<i64: 1, 128>}, {pipeline_mode = #tpu.pipeline_mode<synchronous>, transform_indices = @transform_2, window_bounds = array<i64: 1, 128>}, {pipeline_mode = #tpu.pipeline_mode<synchronous>, transform_indices = @transform_3, window_bounds = array<i64: 1, 128>}, {pipeline_mode = #tpu.pipeline_mode<synchronous>, transform_indices = @transform_4, window_bounds = array<i64: 1, 128>}, {pipeline_mode = #tpu.pipeline_mode<synchronous>, transform_indices = @transform_5, window_bounds = array<i64: 1, 1>}]} {
    %c0 = arith.constant 0 : index
    %0 = memref.load %arg1[%c0] : memref<2xf32, #tpu.memory_space<smem>>
    %c1 = arith.constant 1 : index
    %1 = memref.load %arg1[%c1] : memref<2xf32, #tpu.memory_space<smem>>
    %c0_0 = arith.constant 0 : index
    %c0_1 = arith.constant 0 : index
    %2 = vector.load %arg3[%c0_0, %c0_1] : memref<1x128xf32, #tpu.memory_space<vmem>>, vector<1x128xf32>
    %c0_2 = arith.constant 0 : index
    %c0_3 = arith.constant 0 : index
    %3 = vector.load %arg2[%c0_2, %c0_3] : memref<1x128xf32, #tpu.memory_space<vmem>>, vector<1x128xf32>
    %c0_4 = arith.constant 0 : index
    %c0_5 = arith.constant 0 : index
    %4 = vector.load %arg4[%c0_4, %c0_5] : memref<1x128xf32, #tpu.memory_space<vmem>>, vector<1x128xf32>
    %cst = arith.constant 0.000000e+00 : f32
    %5 = vector.broadcast %cst : f32 to vector<1x128xf32>
    %6 = arith.maximumf %2, %5 : vector<1x128xf32>
    %7 = math.absf %2 : vector<1x128xf32>
    %cst_6 = arith.constant 0.000000e+00 : f32
    %8 = vector.broadcast %cst_6 : f32 to vector<1x128xf32>
    %9 = arith.subf %8, %7 : vector<1x128xf32>
    %10 = math.exp %9 : vector<1x128xf32>
    %11 = math.log1p %10 : vector<1x128xf32>
    %12 = arith.addf %6, %11 : vector<1x128xf32>
    %13 = arith.mulf %12, %4 : vector<1x128xf32>
    %14 = arith.addf %13, %3 : vector<1x128xf32>
    %c0_7 = arith.constant 0 : index
    %c0_8 = arith.constant 0 : index
    %15 = vector.load %arg5[%c0_7, %c0_8] : memref<1x128xf32, #tpu.memory_space<vmem>>, vector<1x128xf32>
    tpu.vector_store %arg5[%c0_7, %c0_8], %14 {strides = array<i32>} : memref<1x128xf32, #tpu.memory_space<vmem>>, vector<1x128xf32>,
    %cst_9 = arith.constant -1.500000e+01 : f32
    %16 = vector.broadcast %cst_9 : f32 to vector<1x128xf32>
    %17 = arith.cmpf olt, %2, %16 : vector<1x128xf32>
    %18 = math.log %12 : vector<1x128xf32>
    %19 = arith.select %17, %2, %18 : vector<1x128xi1>, vector<1x128xf32>
    %20 = arith.mulf %12, %12 : vector<1x128xf32>
    %cst_10 = arith.constant dense<0.000000e+00> : vector<1xf32>
    %21 = vector.multi_reduction <add>, %20, %cst_10 [1] : vector<1x128xf32> to vector<1xf32>
    %22 = vector.shape_cast %21 : vector<1xf32> to vector<1x1xf32>
    %cst_11 = arith.constant dense<0.000000e+00> : vector<1xf32>
    %23 = vector.multi_reduction <add>, %19, %cst_11 [1] : vector<1x128xf32> to vector<1xf32>
    %24 = vector.shape_cast %23 : vector<1xf32> to vector<1x1xf32>
    %25 = arith.mulf %3, %3 : vector<1x128xf32>
    %cst_12 = arith.constant dense<0.000000e+00> : vector<1xf32>
    %26 = vector.multi_reduction <add>, %25, %cst_12 [1] : vector<1x128xf32> to vector<1xf32>
    %27 = vector.shape_cast %26 : vector<1xf32> to vector<1x1xf32>
    %28 = arith.addf %22, %27 : vector<1x1xf32>
    %29 = vector.broadcast %0 : f32 to vector<1x1xf32>
    %30 = arith.mulf %28, %29 : vector<1x1xf32>
    %cst_13 = arith.constant 2.000000e+00 : f32
    %31 = vector.broadcast %cst_13 : f32 to vector<1x1xf32>
    %32 = arith.mulf %31, %24 : vector<1x1xf32>
    %33 = arith.subf %30, %32 : vector<1x1xf32>
    %34 = vector.broadcast %1 : f32 to vector<1x1xf32>
    %35 = arith.addf %33, %34 : vector<1x1xf32>
    %cst_14 = arith.constant 5.000000e-01 : f32
    %36 = vector.broadcast %cst_14 : f32 to vector<1x1xf32>
    %37 = arith.mulf %36, %35 : vector<1x1xf32>
    %c0_15 = arith.constant 0 : index
    %c0_16 = arith.constant 0 : index
    %38 = vector.load %arg6[%c0_15, %c0_16] : memref<1x1xf32, #tpu.memory_space<vmem>>, vector<1x1xf32>
    tpu.vector_store %arg6[%c0_15, %c0_16], %37 {strides = array<i32>} : memref<1x1xf32, #tpu.memory_space<vmem>>, vector<1x1xf32>,
    return
  }
  func.func @transform_0(%arg0: i32) -> i32 {
    %c0_i32 = arith.constant 0 : i32
    %c0_i32_0 = arith.constant 0 : i32
    return %c0_i32 : i32
  }
  func.func @transform_1(%arg0: i32) -> (i32, i32) {
    %c0_i32 = arith.constant 0 : i32
    %c0_i32_0 = arith.constant 0 : i32
    %c0_i32_1 = arith.constant 0 : i32
    return %c0_i32, %c0_i32_0 : i32, i32
  }
  func.func @transform_2(%arg0: i32) -> (i32, i32) {
    %c0_i32 = arith.constant 0 : i32
    %c0_i32_0 = arith.constant 0 : i32
    %c0_i32_1 = arith.constant 0 : i32
    return %c0_i32, %c0_i32_0 : i32, i32
  }
  func.func @transform_3(%arg0: i32) -> (i32, i32) {
    %c0_i32 = arith.constant 0 : i32
    %c0_i32_0 = arith.constant 0 : i32
    %c0_i32_1 = arith.constant 0 : i32
    return %c0_i32, %c0_i32_0 : i32, i32
  }
  func.func @transform_4(%arg0: i32) -> (i32, i32) {
    %c0_i32 = arith.constant 0 : i32
    %c0_i32_0 = arith.constant 0 : i32
    %c0_i32_1 = arith.constant 0 : i32
    return %c0_i32, %c0_i32_0 : i32, i32
  }
  func.func @transform_5(%arg0: i32) -> (i32, i32) {
    %c0_i32 = arith.constant 0 : i32
    %c0_i32_0 = arith.constant 0 : i32
    %c0_i32_1 = arith.constant 0 : i32
    return %c0_i32, %c0_i32_0 : i32, i32
  }
}

</mosaic_0001>

<bundles_post_ra>
// kernel: tpu_custom_call.1
= control target key start
LH: loop header
LB: loop body
LE: loop exit
PB: predicated region body
PF: predicated region fallthrough
CT: control target
= control target key end

     0   :  { %11 = vsyncpa [#allocation4], 0  ;;  %s225_s0 = inlined_call_operand.hbm [shape: f32[2], index: 0, kind: input, shape index: {}]   ;;  %s226_s1 = inlined_call_operand.vmem [shape: f32[1,128], index: 1, kind: input, shape index: {}]   ;;  %s227_s2 = inlined_call_operand.vmem [shape: f32[1,128], index: 2, kind: input, shape index: {}]   ;;  %s228_s3 = inlined_call_operand.vmem [shape: f32[1,128], index: 3, kind: input, shape index: {}]   ;;  %s229_s4 = inlined_call_operand.hbm [shape: f32[1,128], index: 4, kind: output, shape index: {0}]   ;;  %s230_s5 = inlined_call_operand.hbm [shape: f32[1,1], index: 5, kind: output, shape index: {1}]  }
   0x1   :  { %12 = vsyncpa [#allocation3], 0 }
   0x2   :  { %13 = vsyncpa [#allocation7], 0  ;;  %s174_s18 = smov [#allocation2]  }
   0x3   :  { %21 = dma.hbm_to_smem %s225_s0, 16, %s174_s18, [#allocation4]  }
   0x4   :  { %168 = dma.done.wait [#allocation4], 16  }
   0x5   :  { %169 = vsyncadd [#allocation4], 4294967280 }
   0x6   :  { %31 = sfence }
   0x7   :  { %v34_v0 = vld [vmem:[%s227_s2] sm:$0x1]  ;;  %vm60_vm1 = vcmask 1040384  }
   0x8   :  { %v38_v1 = vand.u32 2147483647, %v34_v0  ;;  %v37_v11 = vmax.f32 %v34_v0, 0.0  ;;  %v35_v14 = vld [vmem:[%s226_s1] sm:$0x1]  ;;  %vm55_vm2 = vcmp.lt.f32.partialorder %v34_v0, -15.0 }
   0x9   :  { %v67_v17 = vmul.f32 %v35_v14, %v35_v14  ;;  %v36_v24 = vld [vmem:[%s228_s3] sm:$0x1]  ;;  %s175_s1 = smov [#allocation5]  }
   0xa   :  { %v39_v2 = vsub.f32 0.0, %v38_v1  ;;  %s87_s25 = sshll.u32 %s175_s1, 4  ;;  %s88_s25 = int_to_ptr.vmem [resolvable:$true] %s87_s25 }
   0xb   :  { %v68_v19 = vsel %vm60_vm1, %v67_v17, 0.0  ;;  %s128_s26 = scalar_lea.vmem %s88_s25, 16  ;;  %s132_s27 = scalar_lea.vmem %s88_s25, 32 }
   0xc   :  { %v40_v3 = vmul.f32 1.442695, %v39_v2  ;;  %p129_p0 = scmp.ne.s32.totalorder %s88_s25, %s128_s26  ;;  %p133_p1 = scmp.lt.s32.totalorder %s88_s25, %s88_s25 }
   0xd   :  { %p134_p2 = scmp.lt.s32.totalorder %s132_s27, %s128_s26 }
   0xe   :  { %114 = vpow2.f32 %v40_v3 }
   0xf   :  { %p135_p3 = por %p134_p2, %p133_p1 }
  0x11   :  { %p136_p4 = pnand %p135_p3, %p129_p0 }
  0x1b   :  { %v115_v4 = vpop.eup %114 }
  0x1c   :  { %v42_v5 = vadd.f32 1.0, %v115_v4  ;;  %v45_v6 = vmul.f32 -0.5, %v115_v4  ;;  %v48_v8 = vand.u32 2147483647, %v115_v4 }
  0x1e   :  { %116 = vlog2.f32 %v42_v5  ;;  %v46_v7 = vadd.f32 1.0, %v45_v6  ;;  %vm49_vm0 = vcmp.lt.f32.partialorder %v48_v8, 0.0004427343 }
  0x20   :  { %v47_v9 = vmul.f32 %v115_v4, %v46_v7 }
  0x2b   :  { %v117_v10 = vpop.eup %116 }
  0x2c   :  { %v44_v12 = vmul.f32 0.6931472, %v117_v10 }
  0x2e   :  { %v50_v13 = vsel %vm49_vm0, %v47_v9, %v44_v12 }
  0x2f   :  { %v51_v15 = vadd.f32 %v50_v13, %v37_v11 }
  0x31   :  { %v59_v16 = vmul.f32 %v51_v15, %v51_v15  ;;  %118 = vlog2.f32 %v51_v15  ;;  %v52_v25 = vmul.f32 %v51_v15, %v36_v24 }
  0x33   :  { %v61_v18 = vsel %vm60_vm1, %v59_v16, 0.0  ;;  %v53_v26 = vadd.f32 %v52_v25, %v35_v14 }
  0x34   :  { %62 = vadd.xlane.f32.xlu0 %v61_v18 }
  0x35   :  { %54 = vst [vmem:[#allocation5] sm:$0x1] %v53_v26 }
  0x38   :  { %69 = vadd.xlane.f32.xlu0 %v68_v19 }
  0x3e   :  { %v119_v20 = vpop.eup %118 }
  0x3f   :  { %v57_v21 = vmul.f32 0.6931472, %v119_v20 }
  0x41   :  { %v58_v22 = vsel %vm55_vm2, %v34_v0, %v57_v21 }
  0x42   :  { %v64_v23 = vsel %vm60_vm1, %v58_v22, 0.0 }
  0x43   :  { %65 = vadd.xlane.f32.xlu1 %v64_v23 }
  0x44   :  { %139 = shalt.err (!%p136_p4)
}
  0x45   :  { %90 = dma.vmem_to_hbm [thread:$0]  %s88_s25, 16, %s229_s4, [#allocation3]   ;;  %vm79_vm3 = vcmask 0  }
  0x46   :  { %s32_s3 = sld [smem:[#allocation2]]  ;;  %s176_s6 = smov [#allocation6]  }
  0x47   :  { %s110_s30 = sld [smem:[#allocation2 + $0x1]]  ;;  %s97_s7 = sshll.u32 %s176_s6, 4  ;;  %s98_s7 = int_to_ptr.vmem [resolvable:$true] %s97_s7 }
  0x48   :  { %s148_s8 = scalar_lea.vmem %s98_s7, 16  ;;  %s152_s4 = scalar_lea.vmem %s98_s7, 32 }
  0x49   :  { %p149_p5 = scmp.ne.s32.totalorder %s98_s7, %s148_s8  ;;  %p153_p6 = scmp.lt.s32.totalorder %s98_s7, %s98_s7 }
  0x4a   :  { %p154_p7 = scmp.lt.s32.totalorder %s152_s4, %s148_s8 }
  0x4c   :  { %v72_v30 = vstv %s32_s3  ;;  %p155_p8 = por %p154_p7, %p153_p6 }
  0x4d   :  { %v76_v34 = vstv %s110_s30 }
  0x4e   :  { %p156_p9 = pnand %p155_p8, %p149_p5 }
  0xbd   :  { %v63_v27 = vpop.xlane.xlu0 %62 }
  0xc1   :  { %v70_v28 = vpop.xlane.xlu0 %69 }
  0xc2   :  { %v71_v29 = vadd.f32 %v70_v28, %v63_v27 }
  0xc4   :  { %v73_v32 = vmul.f32 %v72_v30, %v71_v29 }
  0xcc   :  { %v66_v31 = vpop.xlane.xlu1 %65 }
  0xcd   :  { %v74_v33 = vmul.f32 2.0, %v66_v31 }
  0xcf   :  { %v75_v35 = vsub.f32 %v73_v32, %v74_v33 }
  0xd1   :  { %v77_v36 = vadd.f32 %v76_v34, %v75_v35 }
  0xd3   :  { %v78_v37 = vmul.f32 0.5, %v77_v36 }
  0xd5   :  { %80 = vst.msk [vmem:[#allocation6] sm:$0x1] %vm79_vm3, %v78_v37 }
  0xd6   :  { %159 = shalt.err (!%p156_p9)
}
  0xd7   :  { %100 = dma.vmem_to_hbm [thread:$0]  %s98_s7, 16, %s230_s5, [#allocation7]  }
  0xd8   :  { %170 = dma.done.wait [#allocation3], 16  }
  0xd9   :  { %171 = vsyncadd [#allocation3], 4294967280 }
  0xda   :  { %172 = dma.done.wait [#allocation7], 16  }
  0xdb   :  { %173 = vsyncadd [#allocation7], 4294967280 }
  0xdc   :  { %107 = vsyncpa [#allocation3], 1 }
  0xdd   :  { %108 = vsyncpa [#allocation7], 1 }
  0xde   :  { %109 = vsyncpa [#allocation4], 1 }

</bundles_post_ra>
